<compile_context>
chip_gen: v5e
topology: v5e:2x2
jax: 0.10.0
libtpu: 0.0.40
codegen_flags: <defaults>
</compile_context>

<pallas_src>
import math
from functools import partial

import jax
import jax.numpy as jnp
from jax import lax
from jax.experimental import pallas as pl
from jax.experimental.pallas import tpu as pltpu


def make_pe_table(max_len: int, d_model: int) -> jnp.ndarray:
    """Build the [max_len, d_model] sinusoidal PE buffer (matches the PyTorch __init__)."""
    position = jnp.arange(max_len, dtype=jnp.float32)[:, None]               # [L, 1]
    div_term = jnp.exp(
        jnp.arange(0, d_model, 2, dtype=jnp.float32) * (-math.log(10000.0) / d_model)
    )                                                                         # [D/2]
    pe = jnp.zeros((max_len, d_model), dtype=jnp.float32)
    pe = pe.at[:, 0::2].set(jnp.sin(position * div_term))
    pe = pe.at[:, 1::2].set(jnp.cos(position * div_term))
    return pe


def _uniform_bits(seed_u32, row0_u32, shape, n_cols: int):
    """Counter-based uint32 hash (murmur3 finalizer) -> pseudo-random bits per element."""
    rows = lax.broadcasted_iota(jnp.uint32, shape, 0)
    cols = lax.broadcasted_iota(jnp.uint32, shape, 1)
    z = (rows + row0_u32) * jnp.uint32(n_cols) + cols      # global element counter (mod 2^32)
    z = z ^ (seed_u32 * jnp.uint32(0x9E3779B9))
    z = z ^ (z >> 16)
    z = z * jnp.uint32(0x85EBCA6B)
    z = z ^ (z >> 13)
    z = z * jnp.uint32(0xC2B2AE35)
    z = z ^ (z >> 16)
    return z


def _pe_kernel(seed_ref, x_ref, pe_ref, o_ref, *,
               p: float, training: bool,
               tile_rows: int, seq_rows: int, n_cols: int, pe_resident: bool):
    # x_ref / o_ref: (tile_rows, n_cols)  — batch dim squeezed out via block_shape None.
    # pe_ref:        (seq_rows, n_cols) if resident, else (tile_rows, n_cols).
    b = pl.program_id(0)
    t = pl.program_id(1)

    if pe_resident and tile_rows != seq_rows:
        # tile_rows is always a multiple of 8 on this branch (see _pick_tile_rows).
        start = pl.multiple_of(t * tile_rows, 8)
        pe = pe_ref[pl.ds(start, tile_rows), :]
    else:
        pe = pe_ref[...]

    y = x_ref[...] + pe                                    # plain VPU add, no broadcast

    if training and p > 0.0:
        if p >= 1.0:
            # keep-probability is zero: everything dropped (avoids 1/(1-p) div-by-zero).
            y = jnp.zeros_like(y)
        else:
            # Inverted dropout; keep-test stays in the integer domain.
            row0 = (b * seq_rows + t * tile_rows).astype(jnp.uint32)
            bits = _uniform_bits(seed_ref[0].astype(jnp.uint32), row0, y.shape, n_cols)
            thr = jnp.uint32(min(int(round(p * 4294967296.0)), 4294967295))
            keep = bits >= thr                             # P(keep) = 1 - p
            scale = jnp.asarray(1.0 / (1.0 - p), dtype=y.dtype)
            y = jnp.where(keep, y * scale, jnp.zeros_like(y))
            # TODO(synk): dropout matches torch semantics (Bernoulli keep + 1/(1-p) scale)
            # but not torch's exact RNG bitstream.

    o_ref[...] = y.astype(o_ref.dtype)


_TILE_BYTES = 2 * 1024 * 1024          # ~2 MiB per streaming buffer (HBM-roofline sweet spot)
_PE_RESIDENT_BYTES = 4 * 1024 * 1024   # keep the whole PE slab resident when it fits
_VMEM_LIMIT_CAP = 48 * 1024 * 1024     # leave headroom below v7x's 64 MiB physical VMEM


def _pick_tile_rows(seq_rows: int, row_bytes: int, target_bytes: int) -> int:
    """Largest multiple-of-8 divisor of seq_rows whose tile fits target_bytes, else full."""
    if seq_rows * row_bytes <= target_bytes:
        return seq_rows
    best = None
    max_rows = max(8, target_bytes // max(row_bytes, 1))
    for d in range(8, min(seq_rows, int(max_rows)) + 1, 8):
        if seq_rows % d == 0:
            best = d
    return best if best is not None else seq_rows


def positional_encoding(
    x: jnp.ndarray,
    pe_table: jnp.ndarray,
    *,
    p: float = 0.1,
    training: bool = False,
    seed: int = 0,
) -> jnp.ndarray:
    """x: [bs, S, D].  Returns dropout(x + pe[:S])."""
    bs, S, D = x.shape
    itemsize = jnp.dtype(x.dtype).itemsize

    # Cast PE to the activation dtype (halves PE traffic / VMEM for bf16 activations).
    pe_slice = pe_table[:S, :].astype(x.dtype)             # [S, D]

    # Lane-dense layout: fold sequence positions into lanes when D is not 128-aligned.
    fold = 1
    if D % 128 != 0:
        cand = 128 // math.gcd(D, 128)                     # smallest f with (f*D) % 128 == 0
        if S % cand == 0:
            fold = cand
    Sp, Dp = S // fold, D * fold
    x_r = x.reshape(bs, Sp, Dp)                            # pure layout plumbing (contiguous)
    pe_r = pe_slice.reshape(Sp, Dp)

    # Row tiling sized for the VMEM / pipelining budget.
    tile_rows = _pick_tile_rows(Sp, Dp * itemsize, _TILE_BYTES)
    n_tiles = Sp // tile_rows
    pe_resident = (Sp * Dp * itemsize) <= _PE_RESIDENT_BYTES

    if pe_resident:
        # Constant block index across the whole grid -> PE is DMA'd from HBM exactly once.
        pe_spec = pl.BlockSpec((Sp, Dp), lambda b, t, seed_ref: (0, 0))
        pe_buf_bytes = Sp * Dp * itemsize
    else:
        pe_spec = pl.BlockSpec((tile_rows, Dp), lambda b, t, seed_ref: (t, 0))
        pe_buf_bytes = 2 * tile_rows * Dp * itemsize       # double-buffered

    tile_bytes = tile_rows * Dp * itemsize
    vmem_need = 2 * tile_bytes + 2 * tile_bytes + pe_buf_bytes   # 2x in + 2x out + pe
    vmem_limit = int(min(_VMEM_LIMIT_CAP, max(16 * 1024 * 1024, 2 * vmem_need)))

    seed_arr = jnp.array([seed], dtype=jnp.int32)
    kernel = partial(_pe_kernel, p=float(p), training=bool(training),
                     tile_rows=tile_rows, seq_rows=Sp, n_cols=Dp,
                     pe_resident=pe_resident)

    out = pl.pallas_call(
        kernel,
        out_shape=jax.ShapeDtypeStruct((bs, Sp, Dp), x.dtype),
        grid_spec=pltpu.PrefetchScalarGridSpec(
            num_scalar_prefetch=1,                         # seed lands in SMEM
            grid=(bs, n_tiles),                            # t is the inner (fastest) axis
            in_specs=[
                pl.BlockSpec((None, tile_rows, Dp), lambda b, t, seed_ref: (b, t, 0)),
                pe_spec,
            ],
            out_specs=pl.BlockSpec((None, tile_rows, Dp), lambda b, t, seed_ref: (b, t, 0)),
        ),
        compiler_params=pltpu.CompilerParams(
            dimension_semantics=("parallel", "parallel"),  # independent tiles -> both TCs on v7x
            vmem_limit_bytes=vmem_limit,
        ),
    )(seed_arr, x_r, pe_r)

    return out.reshape(bs, S, D)


if __name__ == "__main__":
    d_model = 32
    max_len = 64
    bs, seq_len = 2, 8

    key = jax.random.PRNGKey(0)
    x = jax.random.normal(key, (bs, seq_len, d_model), dtype=jnp.float32)
    pe_table = make_pe_table(max_len, d_model)

    # Eval-mode forward (dropout is identity), matching module.eval() semantics.
    out = jax.block_until_ready(positional_encoding(x, pe_table, p=0.1, training=False))
    ref = x + pe_table[:seq_len][None, :, :]
    assert out.shape == (bs, seq_len, d_model)
    assert jnp.allclose(out, ref, atol=1e-6), "eval mismatch vs reference"

    # Training path: inverted dropout inside the kernel (each output is 0 or (x+pe)/(1-p)).
    p = 0.5
    out_train = jax.block_until_ready(
        positional_encoding(x, pe_table, p=p, training=True, seed=123)
    )
    assert out_train.shape == (bs, seq_len, d_model)
    scaled = ref / (1.0 - p)
    ok = jnp.logical_or(
        jnp.isclose(out_train, 0.0, atol=1e-6),
        jnp.isclose(out_train, scaled, atol=1e-5, rtol=1e-5),
    )
    assert bool(jnp.all(ok)), "dropout output must be 0 or (x+pe)/(1-p)"

    print("KERNEL_OK")
</pallas_src>

<mosaic_0001>
module attributes {stable_mosaic.version = 11 : i64} {
  func.func @_pe_kernel(%arg0: i32, %arg1: i32, %arg2: memref<1xi32, #tpu.memory_space<smem>>, %arg3: memref<1x2x128xf32, #tpu.memory_space<vmem>>, %arg4: memref<2x128xf32, #tpu.memory_space<vmem>>, %arg5: memref<1x2x128xf32, #tpu.memory_space<vmem>>) attributes {dimension_semantics = [#tpu.dimension_semantics<parallel>, #tpu.dimension_semantics<parallel>], iteration_bounds = array<i64: 2, 1>, scalar_prefetch = 1 : i64, scratch_operands = 0 : i64, tpu.core_type = #tpu.core_type<tc>, window_params = [{transform_indices = @transform_0, window_bounds = array<i64: 1, 2, 128>}, {pipeline_mode = #tpu.pipeline_mode<synchronous>, transform_indices = @transform_1, window_bounds = array<i64: 2, 128>}, {transform_indices = @transform_2, window_bounds = array<i64: 1, 2, 128>}]} {
    %c0 = arith.constant 0 : index
    %c0_0 = arith.constant 0 : index
    %0 = vector.load %arg4[%c0, %c0_0] : memref<2x128xf32, #tpu.memory_space<vmem>>, vector<2x128xf32>
    %c0_1 = arith.constant 0 : index
    %c0_2 = arith.constant 0 : index
    %c0_3 = arith.constant 0 : index
    %1 = vector.load %arg3[%c0_1, %c0_2, %c0_3] : memref<1x2x128xf32, #tpu.memory_space<vmem>>, vector<1x2x128xf32>
    %2 = vector.shape_cast %1 : vector<1x2x128xf32> to vector<2x128xf32>
    %3 = arith.addf %2, %0 : vector<2x128xf32>
    %c0_4 = arith.constant 0 : index
    %c0_5 = arith.constant 0 : index
    %c0_6 = arith.constant 0 : index
    %4 = vector.load %arg5[%c0_4, %c0_5, %c0_6] : memref<1x2x128xf32, #tpu.memory_space<vmem>>, vector<1x2x128xf32>
    %5 = vector.shape_cast %4 : vector<1x2x128xf32> to vector<2x128xf32>
    %6 = vector.shape_cast %3 : vector<2x128xf32> to vector<1x2x128xf32>
    tpu.vector_store %arg5[%c0_4, %c0_5, %c0_6], %6 {strides = array<i32>} : memref<1x2x128xf32, #tpu.memory_space<vmem>>, vector<1x2x128xf32>,
    return
  }
  func.func @transform_0(%arg0: i32, %arg1: i32, %arg2: memref<1xi32, #tpu.memory_space<smem>>) -> (i32, i32, i32) {
    %c0_i32 = arith.constant 0 : i32
    %c0_i32_0 = arith.constant 0 : i32
    return %arg0, %arg1, %c0_i32 : i32, i32, i32
  }
  func.func @transform_1(%arg0: i32, %arg1: i32, %arg2: memref<1xi32, #tpu.memory_space<smem>>) -> (i32, i32) {
    %c0_i32 = arith.constant 0 : i32
    %c0_i32_0 = arith.constant 0 : i32
    %c0_i32_1 = arith.constant 0 : i32
    return %c0_i32, %c0_i32_0 : i32, i32
  }
  func.func @transform_2(%arg0: i32, %arg1: i32, %arg2: memref<1xi32, #tpu.memory_space<smem>>) -> (i32, i32, i32) {
    %c0_i32 = arith.constant 0 : i32
    %c0_i32_0 = arith.constant 0 : i32
    return %arg0, %arg1, %c0_i32 : i32, i32, i32
  }
}

</mosaic_0001>

<bundles_post_ra>
// kernel: tpu_custom_call.1
= control target key start
LH: loop header
LB: loop body
LE: loop exit
PB: predicated region body
PF: predicated region fallthrough
CT: control target
= control target key end

     0   :  { %9 = vsyncpa [#allocation5], 0  ;;  %s613_s0 = inlined_call_operand.<no memory space> [shape: s32[1], index: 0, kind: input, shape index: {}]   ;;  %s614_s1 = inlined_call_operand.hbm [shape: f32[2,2,128], index: 1, kind: input, shape index: {}]   ;;  %s615_s2 = inlined_call_operand.vmem [shape: f32[2,128], index: 2, kind: input, shape index: {}]   ;;  %s616_s3 = inlined_call_operand.hbm [shape: f32[2,2,128], index: 3, kind: output, shape index: {}]  }
   0x1   :  { %11 = vsyncpa [#allocation5 + $0x1], 0 }
   0x2   :  { %12 = vsyncpa [#allocation6], 0 }
   0x3   :  { %14 = vsyncpa [#allocation6 + $0x1], 0  ;;  %s490_s12 = smov 0   ;;  %s492_s13 = smov 0  }
   0x4   :  { %s494_s14 = smov 0   ;;  %s496_s0 = smov 0  }
   0x5   :  { %s498_s15 = smov 0   ;;  %s500_s16 = smov 0  }
   0x6 LB: > { %s281_s17 = sadd.s32 4294967295, %s468_s16   ;;  %s282_s18 = sadd.s32 4294967294, %s468_s16   ;;  %s468_s16 = sphi %s500_s16, %s20_s16   ;;  %s464_s15 = sphi %s498_s15, %s625_s15   ;;  %s460_s0 = sphi %s496_s0, %s624_s0   ;;  %s456_s14 = sphi %s494_s14, %s623_s14   ;;  %s452_s13 = sphi %s492_s13, %s622_s13   ;;  %s448_s12 = sphi %s490_s12, %s621_s12  }
   0x7   : > { %s32_s19 = sadd.s32 1, %s464_s15  ;;  %s41_s20 = sadd.s32 1, %s456_s14 }
   0x8   : > { %p34_p0 = scmp.ge.s32.totalorder %s32_s19, 2  ;;  %p48_p1 = scmp.ne.s32.totalorder %s456_s14, %s452_s13 }
   0x9   : > { %p49_p2 = scmp.eq.s32.totalorder %s468_s16, 0  ;;  %p54_p3 = scmp.ne.s32.totalorder %s452_s13, %s448_s12 }
   0xa   : > { %s627_s19 = smov (%p34_p0, %s32_s19), 0  ;;  %p55_p5 = scmp.eq.s32.totalorder %s281_s17, 0 }
   0xb   : > { %p531_p4 = por %p49_p2, %p48_p1  ;;  %s36_s22 = ssub.s32 %s464_s15, %s627_s19 }
   0xc   : > { %p101_p6 = scmp.eq.s32.totalorder %s281_s17, 1  ;;  %p39_p7 = scmp.eq.s32.totalorder %s36_s22, 0 }
   0xd   : > { %p537_p8 = por %p55_p5, %p54_p3  ;;  %p107_p10 = scmp.eq.s32.totalorder %s282_s18, 1 }
   0xe   : > { %p541_p9 = por %p101_p6, %p48_p1  ;;  %p284_p12 = scmp.ge.s32.totalorder %s468_s16, 2 }
   0xf   : > { %s546_s25 = scalar_select %p39_p7, %s456_s14, %s41_s20  }
  0x10   : > { %p548_p11 = por %p107_p10, %p54_p3  ;;  %p306_p13 = scmp.lt.s32.totalorder %s468_s16, 2 }
  0x11   : > { %s130_s27 = sand.u32 1, %s456_s14   ;;  %s286_s29 = sshll.u32 %s464_s15, 1 }
  0x12   : > { %s285_s28 = sshll.u32 %s130_s27, 1  ;;  %s139_s5 = scalar_lea.hbm %s614_s1, %s286_s29 }
  0x13   : > { %s134_s6 = scalar_lea.vmem [#allocation4], %s285_s28  ;;  %s141_s8 = sshll.u32 %s139_s5, 4  ;;  %s142_s8 = int_to_ptr.hbm [resolvable:$true] %s141_s8 }
  0x14   : > { %s143_s7 = sshll.u32 %s134_s6, 4  ;;  %p299_p0 = pnand %p306_p13, %p531_p4  ;;  %s144_s7 = int_to_ptr.vmem [resolvable:$true] %s143_s7 }
  0x15   : > { %p287_p1 = scmp.ge.s32.totalorder %s468_s16, 1  ;;  %p148_p2 = scmp.lt.s32.totalorder %s468_s16, 3 }
  0x16   : > { %s131_s9 = scalar_lea.sflag [#allocation5], %s130_s27 }
  0x17   : > { %301 = dma.hbm_to_vmem [thread:$0]  (!%p299_p0), %s142_s8, 32, %s144_s7, %s131_s9  }
  0x18   : > { %p149_p3 = pnand %p287_p1, %p148_p2 }
  0x19   : > { %s564_s10 = sand.u32 (!%p149_p3), 1, %s452_s13  }
  0x1a   : > { %152 = sbr.rel (%p149_p3) target bundleno = 47 (0x2f), region = 28  ;;  %s288_s11 = sshll.u32 (!%p149_p3), %s564_s10, 1 }
  0x1b   : > { %s155_s17 = scalar_lea.sflag (!%p149_p3), [#allocation5], %s564_s10  ;;  %s158_s18 = scalar_lea.vmem (!%p149_p3), [#allocation4], %s288_s11 }
  0x1f   : > { %439 = dma.done.wait (%p537_p8), %s155_s17, 32  }
  0x20   : > { %441 = vsyncadd (%p537_p8), %s155_s17, 4294967264  ;;  %s291_s20 = sshll.u32 %s460_s0, 1  ;;  %s179_s28 = scalar_lea.vmem [#allocation7], %s288_s11  ;;  %v180_v0 = vld [vmem:[%s615_s2] sm:$0x3] }
  0x21   : > { %s196_s27 = scalar_lea.hbm %s616_s3, %s291_s20  ;;  %s198_s29 = sshll.u32 %s179_s28, 4  ;;  %v181_v1 = vld [vmem:[%s158_s18] sm:$0x3]  ;;  %s199_s29 = int_to_ptr.vmem [resolvable:$true] %s198_s29 }
  0x22   : > { %s200_s30 = sshll.u32 %s196_s27, 4  ;;  %v182_v2 = vadd.f32 %v181_v1, %v180_v0  ;;  %s185_s23 = scalar_lea.sflag [#allocation6], %s564_s10  ;;  %s201_s30 = int_to_ptr.hbm [resolvable:$true] %s200_s30 }
  0x23   : > { %s400_s6 = sshra.s32 %s201_s30, 4  ;;  %s406_s9 = scalar_lea.hbm %s616_s3, 4  ;;  %s401_s6 = int_to_ptr.hbm [resolvable:$true] %s400_s6 }
  0x24   : > { %183 = vst [vmem:[%s179_s28] sm:$0x3] %v182_v2  ;;  %s402_s0 = scalar_lea.hbm %s401_s6, 2  ;;  %p407_p7 = scmp.lt.s32.totalorder %s401_s6, %s616_s3 }
  0x25   : > { %p403_p4 = scmp.ne.s32.totalorder %s401_s6, %s402_s0  ;;  %p408_p8 = scmp.lt.s32.totalorder %s406_s9, %s402_s0 }
  0x27   : > { %p404_p5 = pnand %p403_p4, %p541_p9  ;;  %p409_p10 = por %p408_p8, %p407_p7 }
  0x29   : > { %p405_p6 = pneg %p404_p5 }
  0x2b   : > { %p410_p13 = pnand %p409_p10, %p405_p6 }
  0x2d   : > { %413 = shalt.err (!%p410_p13)
}
  0x2e   : > { %296 = dma.vmem_to_hbm [thread:$0]  (%p541_p9), %s199_s29, 32, %s201_s30, %s185_s23  }
  0x2f PF: > { %s212_s10 = sand.u32 1, %s448_s12   ;;  %p303_p0 = pnand %p284_p12, %p548_p11 }
  0x30   : > { %s213_s18 = scalar_lea.sflag [#allocation6], %s212_s10 }
  0x31   : > { %p304_p1 = pneg %p303_p0 }
  0x33   : > { %443 = dma.done.wait (%p304_p1), %s213_s18, 32  }
  0x34   : > { %445 = vsyncadd (%p304_p1), %s213_s18, 4294967264  ;;  %s20_s16 = sadd.s32 1, %s468_s16   ;;  %s621_s12 = smov %s452_s13 }
  0x35   : > { %p17_p2 = scmp.ge.s32.totalorder %s20_s16, 4   ;;  %s622_s13 = smov %s456_s14 }
  0x36   : > { %s623_s14 = smov %s546_s25  ;;  %s624_s0 = smov %s464_s15 }
  0x37   : > { %s625_s15 = smov %s627_s19  ;;  %19 = sbr.rel (!%p17_p2) target bundleno = 6 (0x6), region = 73 }
  0x3c   :  { %219 = vsyncpa [#allocation5], 1 }
  0x3d   :  { %221 = vsyncpa [#allocation5 + $0x1], 1 }
  0x3e   :  { %222 = vsyncpa [#allocation6], 1 }
  0x3f   :  { %224 = vsyncpa [#allocation6 + $0x1], 1 }

</bundles_post_ra>
